<compile_context>
chip_gen: v7x
topology: tpu7x:2x2x1
jax: 0.10.0
libtpu: 0.0.40
codegen_flags: <defaults>
</compile_context>

<pallas_src>
import functools

import jax
import jax.numpy as jnp
import numpy as np
from jax.experimental import pallas as pl
from jax.experimental.pallas import tpu as pltpu

_IDX_PAD = 128          # 101 grid indices lane-padded to a full 128-lane group
_CLIP = 50              # the module hard-codes clip(-50, 50) + 50


def _dot_tracking_kernel(ev_ref, cr_ref, calib_ref, calib_t_ref, table_ref,
                         mask_ref, pd_ref, corr_ref, out_ref,
                         *, dots, events, threshold, regularize, reg_scale):
    D = dots
    E = events
    R = D * E                         # one row per (dot, event) pair, r = d*E+e

    # ---- integer grid indices per (dot, event) row --------------------------
    ev = ev_ref[...]                                   # (R, 2)  [ey, ex]
    cr = cr_ref[...]                                   # (R, 2)  [cy, cx]
    ev_t = ev.astype(jnp.int32).astype(jnp.float32)    # events_*.long()
    d_xy = (ev_t - cr).astype(jnp.int32)               # .long(): trunc toward 0
    idx = jnp.clip(d_xy, -_CLIP, _CLIP) + _CLIP        # (R, 2) in [0, 100]
    ix = idx[:, 1:2]                                   # x -> first grid axis
    iy = idx[:, 0:1]                                   # y -> second grid axis

    # ---- factorized gather: one-hot(x) @ [Gx | Gy], then mask with one-hot(y)
    lane = jax.lax.broadcasted_iota(jnp.int32, (1, _IDX_PAD), 1)
    onehot_x = (ix == lane).astype(jnp.float32)        # (R, 128) selects row
    onehot_y = (iy == lane).astype(jnp.float32)        # (R, 128) selects column
    rows = jnp.dot(onehot_x, table_ref[...],
                   preferred_element_type=jnp.float32)  # (R, 256)
    px = rows[:, 0:_IDX_PAD] * onehot_y                 # nonzero only at iy:
    py = rows[:, _IDX_PAD:2 * _IDX_PAD] * onehot_y      #   test[:, :, 0/1]
    nzp = (px != 0.0).astype(jnp.float32) + (py != 0.0).astype(jnp.float32)

    # ---- per-dot reduction over events (segment matmul, no reshapes) --------
    d_iota = jax.lax.broadcasted_iota(jnp.int32, (D, R), 0)
    r_iota = jax.lax.broadcasted_iota(jnp.int32, (D, R), 1)
    seg = ((r_iota >= d_iota * E) & (r_iota < d_iota * E + E)
           ).astype(jnp.float32)                        # (D, R): r // E == d
    red_x = jnp.dot(seg, px, preferred_element_type=jnp.float32)   # (D, 128)
    red_y = jnp.dot(seg, py, preferred_element_type=jnp.float32)
    red_n = jnp.dot(seg, nzp, preferred_element_type=jnp.float32)
    update_dx_fast = jnp.sum(red_x, axis=1, keepdims=True)          # (D, 1)
    update_dy_fast = jnp.sum(red_y, axis=1, keepdims=True)
    nonzero_count = jnp.sum(red_n, axis=1, keepdims=True)

    decider = (nonzero_count >= threshold).astype(jnp.float32)
    udx = jnp.clip(update_dx_fast, -400.0, 400.0)
    udy = jnp.clip(update_dy_fast, -400.0, 400.0)

    calib = calib_ref[...]                              # (D, 2)
    cx_col = calib[:, 1:2]
    cy_col = calib[:, 0:1]
    lr = 200.0 * 1.5e-05
    if regularize:
        calib_t = calib_t_ref[...]                      # (2, D)
        cx_row = calib_t[1:2, :]                        # (1, D)
        cy_row = calib_t[0:1, :]
        dx_centers = cx_row - cx_col                    # [i, j] = cx[j] - cx[i]
        dy_centers = cy_row - cy_col
        mask = mask_ref[...]                            # (D, D)
        pd = pd_ref[...]                                # (D, D)
        sdx = dx_centers * mask
        sdy = dy_centers * mask
        radi = sdx * sdx + sdy * sdy - pd * pd
        dtx = 4.0 * dx_centers * radi
        dty = 4.0 * dy_centers * radi
        corr = corr_ref[...]                            # (D, 1)
        cdx = corr * jnp.sum(dtx, axis=1, keepdims=True)
        cdy = corr * jnp.sum(dty, axis=1, keepdims=True)
        new_cx = cx_col - lr * decider * (udx - reg_scale * cdx)
        new_cy = cy_col - lr * decider * (udy - reg_scale * cdy)
    else:
        new_cx = cx_col - lr * decider * udx
        new_cy = cy_col - lr * decider * udy

    # Single full-tile store: col 0 = y, col 1 = x.
    col = jax.lax.broadcasted_iota(jnp.int32, (D, 2), 1)
    out_ref[...] = jnp.where(col == 0, new_cy, new_cx)


class DotTrackingOnnxModelFilterPallas:
    """Pallas TPU version of DotTrackingOnnxModelFilter (functional: returns
    the updated calib_center instead of mutating it in place)."""

    def __init__(self, precompute_grid, pairwise_dists_mask, pairwise_dists,
                 correction, dot_regularization_factor, regularize_tracking,
                 downsample_factor_internally):
        grid = jnp.asarray(precompute_grid, jnp.float32)    # (101, 101, 2)
        side0, side1, _ = grid.shape
        assert side0 <= _IDX_PAD and side1 <= _IDX_PAD
        pad = ((0, _IDX_PAD - side0), (0, _IDX_PAD - side1))
        gx = jnp.pad(grid[:, :, 0], pad)
        gy = jnp.pad(grid[:, :, 1], pad)
        # Lane-padded lookup table: cols 0:128 = grid[...,0], 128:256 = grid[...,1].
        # Kept in f32 (128 KiB) so arbitrary grid values stay exact.
        self.table = jnp.concatenate([gx, gy], axis=1)       # (128, 256)

        self.pairwise_dists_mask = jnp.asarray(pairwise_dists_mask, jnp.float32)
        self.pairwise_dists = jnp.asarray(pairwise_dists, jnp.float32)
        self.correction = jnp.asarray(correction, jnp.float32).reshape(-1, 1)
        self.dot_regularization_factor = float(dot_regularization_factor)
        self.regularize_tracking = bool(regularize_tracking)
        self.threshold_update = 10 + 3 * (downsample_factor_internally - 1)

    def __call__(self, events_x, events_y, calib_center):
        calib = jnp.asarray(calib_center, jnp.float32)       # (D, 2) [y, x]
        D = calib.shape[0]
        ex = jnp.asarray(events_x, jnp.float32).reshape(-1)
        ey = jnp.asarray(events_y, jnp.float32).reshape(-1)
        E = ex.shape[0]

        # Layout plumbing (outside the kernel): one row per (dot, event) pair,
        # r = d*E + e, so the in-kernel one-hots fill a full MXU M tile.
        ev_rows = jnp.tile(jnp.stack([ey, ex], axis=1), (D, 1))   # (D*E, 2)
        c_rows = jnp.repeat(calib, E, axis=0)                     # (D*E, 2)

        kernel = functools.partial(
            _dot_tracking_kernel,
            dots=D, events=E,
            threshold=float(self.threshold_update),
            regularize=self.regularize_tracking,
            reg_scale=self.dot_regularization_factor * 2.5e-07)

        vmem = pl.BlockSpec(memory_space=pltpu.MemorySpace.VMEM)
        return pl.pallas_call(
            kernel,
            out_shape=jax.ShapeDtypeStruct((D, 2), jnp.float32),
            in_specs=[vmem] * 8,
            out_specs=vmem,
            compiler_params=pltpu.CompilerParams(
                vmem_limit_bytes=16 * 1024 * 1024),
        )(ev_rows, c_rows, calib, calib.T, self.table,
          self.pairwise_dists_mask, self.pairwise_dists, self.correction)


def _numpy_reference(grid, mask, pd, corr, reg_factor, regularize, threshold,
                     events_x, events_y, calib_center):
    cc = np.asarray(calib_center, np.float32)
    ex = events_x.astype(np.int64)
    ey = events_y.astype(np.int64)
    dx = np.trunc(ex[None, :].astype(np.float64) - cc[:, 1:2]).astype(np.int64)
    dy = np.trunc(ey[None, :].astype(np.float64) - cc[:, 0:1]).astype(np.int64)
    test = grid[np.clip(dx, -50, 50) + 50, np.clip(dy, -50, 50) + 50, :]
    decider = (np.sum(np.sum(test != 0, axis=2), axis=1) >= threshold
               ).astype(np.float32)
    udx = np.clip(np.sum(test[:, :, 0], axis=1), -400, 400)
    udy = np.clip(np.sum(test[:, :, 1], axis=1), -400, 400)
    cx = cc[:, 1]
    cy = cc[:, 0]
    if regularize:
        dxc = cx[None, :] - cx[:, None]
        dyc = cy[None, :] - cy[:, None]
        sdx = dxc * mask
        sdy = dyc * mask
        radi = sdx ** 2 + sdy ** 2 - pd ** 2
        dtx = 4.0 * dxc * radi
        dty = 4.0 * dyc * radi
        cdx = corr * dtx.sum(axis=1)
        cdy = corr * dty.sum(axis=1)
        new_x = cx - 200 * 1.5e-05 * decider * (udx - reg_factor * 2.5e-07 * cdx)
        new_y = cy - 200 * 1.5e-05 * decider * (udy - reg_factor * 2.5e-07 * cdy)
    else:
        new_x = cx - 200 * 1.5e-05 * decider * udx
        new_y = cy - 200 * 1.5e-05 * decider * udy
    out = cc.copy()
    out[:, 1] = new_x
    out[:, 0] = new_y
    return out


if __name__ == "__main__":
    key = jax.random.PRNGKey(0)
    k1, k2, k3, k4, k5 = jax.random.split(key, 5)

    D = 8        # number of tracked dots
    E = 16       # number of events
    SIDE = 101   # precompute grid side (indices clipped to [-50, 50] + 50)

    # Deterministic synthetic parameters (shapes implied by the module).
    precompute_grid = jax.random.randint(k1, (SIDE, SIDE, 2), -3, 4
                                         ).astype(jnp.float32)
    pairwise_dists = jax.random.uniform(k5, (D, D), jnp.float32, 5.0, 30.0)
    pairwise_dists_mask = 1.0 - jnp.eye(D, dtype=jnp.float32)
    correction = jnp.full((D,), 1.0 / (D - 1), jnp.float32)

    # Deterministic inputs.
    calib_center = jax.random.uniform(k2, (D, 2), jnp.float32, 30.0, 70.0)
    events_x = jnp.floor(jax.random.uniform(k3, (E,), jnp.float32, 10.0, 90.0))
    events_y = jnp.floor(jax.random.uniform(k4, (E,), jnp.float32, 10.0, 90.0))

    filt = DotTrackingOnnxModelFilterPallas(
        precompute_grid, pairwise_dists_mask, pairwise_dists, correction,
        dot_regularization_factor=1.0, regularize_tracking=True,
        downsample_factor_internally=1)

    out = filt(events_x, events_y, calib_center)
    out = jax.block_until_ready(out)

    ref = _numpy_reference(
        np.asarray(precompute_grid), np.asarray(pairwise_dists_mask),
        np.asarray(pairwise_dists), np.asarray(correction),
        1.0, True, filt.threshold_update,
        np.asarray(events_x), np.asarray(events_y), np.asarray(calib_center))

    np.testing.assert_allclose(np.asarray(out), ref, rtol=1e-4, atol=1e-4)
    print("KERNEL_OK")
</pallas_src>

<mosaic_0001>
module attributes {stable_mosaic.version = 11 : i64} {
  func.func @_dot_tracking_kernel(%arg0: memref<128x2xf32, #tpu.memory_space<vmem>>, %arg1: memref<128x2xf32, #tpu.memory_space<vmem>>, %arg2: memref<8x2xf32, #tpu.memory_space<vmem>>, %arg3: memref<2x8xf32, #tpu.memory_space<vmem>>, %arg4: memref<128x256xf32, #tpu.memory_space<vmem>>, %arg5: memref<8x8xf32, #tpu.memory_space<vmem>>, %arg6: memref<8x8xf32, #tpu.memory_space<vmem>>, %arg7: memref<8x1xf32, #tpu.memory_space<vmem>>, %arg8: memref<8x2xf32, #tpu.memory_space<vmem>>) attributes {dimension_semantics = [], scalar_prefetch = 0 : i64, scratch_operands = 0 : i64, tpu.core_type = #tpu.core_type<tc>} {
    %c0 = arith.constant 0 : index
    %c0_0 = arith.constant 0 : index
    %0 = vector.load %arg0[%c0, %c0_0] : memref<128x2xf32, #tpu.memory_space<vmem>>, vector<128x2xf32>
    %c0_1 = arith.constant 0 : index
    %c0_2 = arith.constant 0 : index
    %1 = vector.load %arg1[%c0_1, %c0_2] : memref<128x2xf32, #tpu.memory_space<vmem>>, vector<128x2xf32>
    %2 = arith.fptosi %0 : vector<128x2xf32> to vector<128x2xi32>
    %3 = arith.sitofp %2 : vector<128x2xi32> to vector<128x2xf32>
    %4 = arith.subf %3, %1 : vector<128x2xf32>
    %5 = arith.fptosi %4 : vector<128x2xf32> to vector<128x2xi32>
    %c-50_i32 = arith.constant -50 : i32
    %c50_i32 = arith.constant 50 : i32
    %6 = vector.broadcast %c-50_i32 : i32 to vector<128x2xi32>
    %7 = arith.maxsi %6, %5 : vector<128x2xi32>
    %8 = vector.broadcast %c50_i32 : i32 to vector<128x2xi32>
    %9 = arith.minsi %8, %7 : vector<128x2xi32>
    %c50_i32_3 = arith.constant 50 : i32
    %10 = vector.broadcast %c50_i32_3 : i32 to vector<128x2xi32>
    %11 = arith.addi %9, %10 : vector<128x2xi32>
    %12 = vector.extract_strided_slice %11 {offsets = [0, 1], sizes = [128, 1], strides = [1, 1]} : vector<128x2xi32> to vector<128x1xi32>
    %13 = vector.extract_strided_slice %11 {offsets = [0, 0], sizes = [128, 1], strides = [1, 1]} : vector<128x2xi32> to vector<128x1xi32>
    %14 = tpu.iota {dimensions = array<i32: 1>} : vector<1x128xi32>
    %15 = vector.broadcast %12 : vector<128x1xi32> to vector<128x128xi32>
    %16 = vector.broadcast %14 : vector<1x128xi32> to vector<128x128xi32>
    %17 = arith.cmpi eq, %15, %16 : vector<128x128xi32>
    %18 = arith.extui %17 : vector<128x128xi1> to vector<128x128xi32>
    %19 = arith.sitofp %18 : vector<128x128xi32> to vector<128x128xf32>
    %20 = vector.broadcast %13 : vector<128x1xi32> to vector<128x128xi32>
    %21 = vector.broadcast %14 : vector<1x128xi32> to vector<128x128xi32>
    %22 = arith.cmpi eq, %20, %21 : vector<128x128xi32>
    %23 = arith.extui %22 : vector<128x128xi1> to vector<128x128xi32>
    %24 = arith.sitofp %23 : vector<128x128xi32> to vector<128x128xf32>
    %c0_4 = arith.constant 0 : index
    %c0_5 = arith.constant 0 : index
    %25 = vector.load %arg4[%c0_4, %c0_5] : memref<128x256xf32, #tpu.memory_space<vmem>>, vector<128x256xf32>
    %cst = arith.constant dense<0.000000e+00> : vector<128x256xf32>
    %26 = tpu.matmul %19, %25, %cst {dimension_numbers = #tpu.dot_dimension_numbers<[1], [0], [0], [1], [0, 0, 1, 1], [], []>} : vector<128x128xf32>, vector<128x256xf32>, vector<128x256xf32> -> vector<128x256xf32>
    %27 = vector.extract_strided_slice %26 {offsets = [0, 0], sizes = [128, 128], strides = [1, 1]} : vector<128x256xf32> to vector<128x128xf32>
    %28 = arith.mulf %27, %24 : vector<128x128xf32>
    %29 = vector.extract_strided_slice %26 {offsets = [0, 128], sizes = [128, 128], strides = [1, 1]} : vector<128x256xf32> to vector<128x128xf32>
    %30 = arith.mulf %29, %24 : vector<128x128xf32>
    %cst_6 = arith.constant 0.000000e+00 : f32
    %31 = vector.broadcast %cst_6 : f32 to vector<128x128xf32>
    %32 = arith.cmpf one, %28, %31 : vector<128x128xf32>
    %33 = arith.extui %32 : vector<128x128xi1> to vector<128x128xi32>
    %34 = arith.sitofp %33 : vector<128x128xi32> to vector<128x128xf32>
    %cst_7 = arith.constant 0.000000e+00 : f32
    %35 = vector.broadcast %cst_7 : f32 to vector<128x128xf32>
    %36 = arith.cmpf one, %30, %35 : vector<128x128xf32>
    %37 = arith.extui %36 : vector<128x128xi1> to vector<128x128xi32>
    %38 = arith.sitofp %37 : vector<128x128xi32> to vector<128x128xf32>
    %39 = arith.addf %34, %38 : vector<128x128xf32>
    %40 = tpu.iota {dimensions = array<i32: 0>} : vector<8x128xi32>
    %41 = tpu.iota {dimensions = array<i32: 1>} : vector<8x128xi32>
    %c16_i32 = arith.constant 16 : i32
    %42 = vector.broadcast %c16_i32 : i32 to vector<8x128xi32>
    %43 = arith.muli %40, %42 : vector<8x128xi32>
    %44 = arith.cmpi sge, %41, %43 : vector<8x128xi32>
    %c16_i32_8 = arith.constant 16 : i32
    %45 = vector.broadcast %c16_i32_8 : i32 to vector<8x128xi32>
    %46 = arith.muli %40, %45 : vector<8x128xi32>
    %c16_i32_9 = arith.constant 16 : i32
    %47 = vector.broadcast %c16_i32_9 : i32 to vector<8x128xi32>
    %48 = arith.addi %46, %47 : vector<8x128xi32>
    %49 = arith.cmpi slt, %41, %48 : vector<8x128xi32>
    %50 = arith.andi %44, %49 : vector<8x128xi1>
    %51 = arith.extui %50 : vector<8x128xi1> to vector<8x128xi32>
    %52 = arith.sitofp %51 : vector<8x128xi32> to vector<8x128xf32>
    %cst_10 = arith.constant dense<0.000000e+00> : vector<8x128xf32>
    %53 = tpu.matmul %52, %28, %cst_10 {dimension_numbers = #tpu.dot_dimension_numbers<[1], [0], [0], [1], [0, 0, 1, 1], [], []>} : vector<8x128xf32>, vector<128x128xf32>, vector<8x128xf32> -> vector<8x128xf32>
    %cst_11 = arith.constant dense<0.000000e+00> : vector<8x128xf32>
    %54 = tpu.matmul %52, %30, %cst_11 {dimension_numbers = #tpu.dot_dimension_numbers<[1], [0], [0], [1], [0, 0, 1, 1], [], []>} : vector<8x128xf32>, vector<128x128xf32>, vector<8x128xf32> -> vector<8x128xf32>
    %cst_12 = arith.constant dense<0.000000e+00> : vector<8x128xf32>
    %55 = tpu.matmul %52, %39, %cst_12 {dimension_numbers = #tpu.dot_dimension_numbers<[1], [0], [0], [1], [0, 0, 1, 1], [], []>} : vector<8x128xf32>, vector<128x128xf32>, vector<8x128xf32> -> vector<8x128xf32>
    %cst_13 = arith.constant dense<0.000000e+00> : vector<8xf32>
    %56 = vector.multi_reduction <add>, %53, %cst_13 [1] : vector<8x128xf32> to vector<8xf32>
    %57 = vector.shape_cast %56 : vector<8xf32> to vector<8x1xf32>
    %cst_14 = arith.constant dense<0.000000e+00> : vector<8xf32>
    %58 = vector.multi_reduction <add>, %54, %cst_14 [1] : vector<8x128xf32> to vector<8xf32>
    %59 = vector.shape_cast %58 : vector<8xf32> to vector<8x1xf32>
    %cst_15 = arith.constant dense<0.000000e+00> : vector<8xf32>
    %60 = vector.multi_reduction <add>, %55, %cst_15 [1] : vector<8x128xf32> to vector<8xf32>
    %61 = vector.shape_cast %60 : vector<8xf32> to vector<8x1xf32>
    %cst_16 = arith.constant 1.000000e+01 : f32
    %62 = vector.broadcast %cst_16 : f32 to vector<8x1xf32>
    %63 = arith.cmpf oge, %61, %62 : vector<8x1xf32>
    %64 = arith.extui %63 : vector<8x1xi1> to vector<8x1xi32>
    %65 = arith.sitofp %64 : vector<8x1xi32> to vector<8x1xf32>
    %cst_17 = arith.constant -4.000000e+02 : f32
    %cst_18 = arith.constant 4.000000e+02 : f32
    %66 = vector.broadcast %cst_17 : f32 to vector<8x1xf32>
    %67 = arith.maximumf %66, %57 : vector<8x1xf32>
    %68 = vector.broadcast %cst_18 : f32 to vector<8x1xf32>
    %69 = arith.minimumf %68, %67 : vector<8x1xf32>
    %cst_19 = arith.constant -4.000000e+02 : f32
    %cst_20 = arith.constant 4.000000e+02 : f32
    %70 = vector.broadcast %cst_19 : f32 to vector<8x1xf32>
    %71 = arith.maximumf %70, %59 : vector<8x1xf32>
    %72 = vector.broadcast %cst_20 : f32 to vector<8x1xf32>
    %73 = arith.minimumf %72, %71 : vector<8x1xf32>
    %c0_21 = arith.constant 0 : index
    %c0_22 = arith.constant 0 : index
    %74 = vector.load %arg2[%c0_21, %c0_22] : memref<8x2xf32, #tpu.memory_space<vmem>>, vector<8x2xf32>
    %75 = vector.extract_strided_slice %74 {offsets = [0, 1], sizes = [8, 1], strides = [1, 1]} : vector<8x2xf32> to vector<8x1xf32>
    %76 = vector.extract_strided_slice %74 {offsets = [0, 0], sizes = [8, 1], strides = [1, 1]} : vector<8x2xf32> to vector<8x1xf32>
    %c0_23 = arith.constant 0 : index
    %c0_24 = arith.constant 0 : index
    %77 = vector.load %arg3[%c0_23, %c0_24] : memref<2x8xf32, #tpu.memory_space<vmem>>, vector<2x8xf32>
    %78 = vector.extract_strided_slice %77 {offsets = [1, 0], sizes = [1, 8], strides = [1, 1]} : vector<2x8xf32> to vector<1x8xf32>
    %79 = vector.extract_strided_slice %77 {offsets = [0, 0], sizes = [1, 8], strides = [1, 1]} : vector<2x8xf32> to vector<1x8xf32>
    %80 = vector.broadcast %78 : vector<1x8xf32> to vector<8x8xf32>
    %81 = vector.broadcast %75 : vector<8x1xf32> to vector<8x8xf32>
    %82 = arith.subf %80, %81 : vector<8x8xf32>
    %83 = vector.broadcast %79 : vector<1x8xf32> to vector<8x8xf32>
    %84 = vector.broadcast %76 : vector<8x1xf32> to vector<8x8xf32>
    %85 = arith.subf %83, %84 : vector<8x8xf32>
    %c0_25 = arith.constant 0 : index
    %c0_26 = arith.constant 0 : index
    %86 = vector.load %arg5[%c0_25, %c0_26] : memref<8x8xf32, #tpu.memory_space<vmem>>, vector<8x8xf32>
    %c0_27 = arith.constant 0 : index
    %c0_28 = arith.constant 0 : index
    %87 = vector.load %arg6[%c0_27, %c0_28] : memref<8x8xf32, #tpu.memory_space<vmem>>, vector<8x8xf32>
    %88 = arith.mulf %82, %86 : vector<8x8xf32>
    %89 = arith.mulf %85, %86 : vector<8x8xf32>
    %90 = arith.mulf %88, %88 : vector<8x8xf32>
    %91 = arith.mulf %89, %89 : vector<8x8xf32>
    %92 = arith.addf %90, %91 : vector<8x8xf32>
    %93 = arith.mulf %87, %87 : vector<8x8xf32>
    %94 = arith.subf %92, %93 : vector<8x8xf32>
    %cst_29 = arith.constant 4.000000e+00 : f32
    %95 = vector.broadcast %cst_29 : f32 to vector<8x8xf32>
    %96 = arith.mulf %95, %82 : vector<8x8xf32>
    %97 = arith.mulf %96, %94 : vector<8x8xf32>
    %cst_30 = arith.constant 4.000000e+00 : f32
    %98 = vector.broadcast %cst_30 : f32 to vector<8x8xf32>
    %99 = arith.mulf %98, %85 : vector<8x8xf32>
    %100 = arith.mulf %99, %94 : vector<8x8xf32>
    %c0_31 = arith.constant 0 : index
    %c0_32 = arith.constant 0 : index
    %101 = vector.load %arg7[%c0_31, %c0_32] : memref<8x1xf32, #tpu.memory_space<vmem>>, vector<8x1xf32>
    %cst_33 = arith.constant dense<0.000000e+00> : vector<8xf32>
    %102 = vector.multi_reduction <add>, %97, %cst_33 [1] : vector<8x8xf32> to vector<8xf32>
    %103 = vector.shape_cast %102 : vector<8xf32> to vector<8x1xf32>
    %104 = arith.mulf %101, %103 : vector<8x1xf32>
    %cst_34 = arith.constant dense<0.000000e+00> : vector<8xf32>
    %105 = vector.multi_reduction <add>, %100, %cst_34 [1] : vector<8x8xf32> to vector<8xf32>
    %106 = vector.shape_cast %105 : vector<8xf32> to vector<8x1xf32>
    %107 = arith.mulf %101, %106 : vector<8x1xf32>
    %cst_35 = arith.constant 3.000000e-03 : f32
    %108 = vector.broadcast %cst_35 : f32 to vector<8x1xf32>
    %109 = arith.mulf %108, %65 : vector<8x1xf32>
    %cst_36 = arith.constant 2.500000e-07 : f32
    %110 = vector.broadcast %cst_36 : f32 to vector<8x1xf32>
    %111 = arith.mulf %110, %104 : vector<8x1xf32>
    %112 = arith.subf %69, %111 : vector<8x1xf32>
    %113 = arith.mulf %109, %112 : vector<8x1xf32>
    %114 = arith.subf %75, %113 : vector<8x1xf32>
    %cst_37 = arith.constant 3.000000e-03 : f32
    %115 = vector.broadcast %cst_37 : f32 to vector<8x1xf32>
    %116 = arith.mulf %115, %65 : vector<8x1xf32>
    %cst_38 = arith.constant 2.500000e-07 : f32
    %117 = vector.broadcast %cst_38 : f32 to vector<8x1xf32>
    %118 = arith.mulf %117, %107 : vector<8x1xf32>
    %119 = arith.subf %73, %118 : vector<8x1xf32>
    %120 = arith.mulf %116, %119 : vector<8x1xf32>
    %121 = arith.subf %76, %120 : vector<8x1xf32>
    %122 = tpu.iota {dimensions = array<i32: 1>} : vector<8x2xi32>
    %c0_i32 = arith.constant 0 : i32
    %123 = vector.broadcast %c0_i32 : i32 to vector<8x2xi32>
    %124 = arith.cmpi eq, %122, %123 : vector<8x2xi32>
    %125 = vector.shape_cast %121 : vector<8x1xf32> to vector<8x1xf32>
    %126 = vector.broadcast %125 : vector<8x1xf32> to vector<8x2xf32>
    %127 = vector.shape_cast %114 : vector<8x1xf32> to vector<8x1xf32>
    %128 = vector.broadcast %127 : vector<8x1xf32> to vector<8x2xf32>
    %129 = arith.select %124, %126, %128 : vector<8x2xi1>, vector<8x2xf32>
    %c0_39 = arith.constant 0 : index
    %c0_40 = arith.constant 0 : index
    %130 = vector.load %arg8[%c0_39, %c0_40] : memref<8x2xf32, #tpu.memory_space<vmem>>, vector<8x2xf32>
    tpu.vector_store %arg8[%c0_39, %c0_40], %129 {strides = array<i32>} : memref<8x2xf32, #tpu.memory_space<vmem>>, vector<8x2xf32>,
    return
  }
}

</mosaic_0001>

<bundles_post_ra>
// kernel: tpu_custom_call.1
= control target key start
LH: loop header
LB: loop body
LE: loop exit
PB: predicated region body
PF: predicated region fallthrough
CT: control target
= control target key end

     0   :  { %v1467_v0 = vmov 1   ;;  %s2081_s0 = inlined_call_operand.vmem [shape: f32[128,2], index: 0, kind: input, shape index: {}]   ;;  %s2082_s1 = inlined_call_operand.vmem [shape: f32[128,2], index: 1, kind: input, shape index: {}]   ;;  %s2083_s4 = inlined_call_operand.vmem [shape: f32[128,256], index: 4, kind: input, shape index: {}]   ;;  %s2084_s2 = inlined_call_operand.vmem [shape: f32[8,2], index: 2, kind: input, shape index: {}]   ;;  %s2085_s3 = inlined_call_operand.vmem [shape: f32[2,8], index: 3, kind: input, shape index: {}]   ;;  %s2086_s5 = inlined_call_operand.vmem [shape: f32[8,8], index: 5, kind: input, shape index: {}]   ;;  %s2087_s6 = inlined_call_operand.vmem [shape: f32[8,8], index: 6, kind: input, shape index: {}]   ;;  %s2088_s7 = inlined_call_operand.vmem [shape: f32[8,1], index: 7, kind: input, shape index: {}]   ;;  %s2089_s8 = inlined_call_operand.vmem [shape: f32[8,2], index: 8, kind: output, shape index: {}]  }
   0x1   :  { %1462 = vset.pattern.permute.xlu1 %v1467_v0  ;;  %1461 = vset.pattern.permute.xlu0 %v1467_v0  ;;  %v31_v1 = vld [vmem:[%s2081_s0 + $0x10] sm:$0xff]  ;;  %v29_v2 = vld [vmem:[%s2081_s0] sm:$0xff]  ;;  %v32_v5 = vld [vmem:[%s2081_s0 + $0x18] sm:$0xff] }
   0x2   :  { %v1394_v3 = vtrunc.f32 %v31_v1  ;;  %v1390_v4 = vtrunc.f32 %v29_v2  ;;  %v1396_v6 = vtrunc.f32 %v32_v5  ;;  %v30_v7 = vld [vmem:[%s2081_s0 + $0x8] sm:$0xff]  ;;  %v47_v9 = vld [vmem:[%s2082_s1 + $0x10] sm:$0xff]  ;;  %v33_v14 = vld [vmem:[%s2081_s0 + $0x20] sm:$0xff] }
   0x3   :  { %v34_v8 = vld [vmem:[%s2081_s0 + $0x28] sm:$0xff]  ;;  %v1392_v12 = vtrunc.f32 %v30_v7  ;;  %v45_v15 = vld [vmem:[%s2082_s1] sm:$0xff]  ;;  %v1398_v17 = vtrunc.f32 %v33_v14  ;;  %v36_v18 = vld [vmem:[%s2081_s0 + $0x38] sm:$0xff] }
   0x4   :  { %v1395_v10 = vcvt.f32.s32 %v1394_v3  ;;  %v1391_v11 = vcvt.f32.s32 %v1390_v4  ;;  %v1400_v13 = vtrunc.f32 %v34_v8  ;;  %v1397_v16 = vcvt.f32.s32 %v1396_v6  ;;  %v35_v19 = vld [vmem:[%s2081_s0 + $0x30] sm:$0xff]  ;;  %v48_v22 = vld [vmem:[%s2082_s1 + $0x18] sm:$0xff]  ;;  %v46_v26 = vld [vmem:[%s2082_s1 + $0x8] sm:$0xff] }
   0x5   :  { %v1393_v23 = vcvt.f32.s32 %v1392_v12  ;;  %v50_v27 = vld [vmem:[%s2082_s1 + $0x28] sm:$0xff]  ;;  %v1399_v28 = vcvt.f32.s32 %v1398_v17  ;;  %v1404_v29 = vtrunc.f32 %v36_v18  ;;  %v1402_v30 = vtrunc.f32 %v35_v19  ;;  %v49_v35 = vld [vmem:[%s2082_s1 + $0x20] sm:$0xff]  ;;  %v52_v44 = vld [vmem:[%s2082_s1 + $0x38] sm:$0xff] }
   0x6   :  { %v79_v20 = vcvt.s32.f32 %v1395_v10  ;;  %v77_v21 = vcvt.s32.f32 %v1391_v11  ;;  %v1401_v24 = vcvt.f32.s32 %v1400_v13  ;;  %v80_v25 = vcvt.s32.f32 %v1397_v16  ;;  %v51_v45 = vld [vmem:[%s2082_s1 + $0x30] sm:$0xff]  ;;  %v38_v7 = vld [vmem:[%s2081_s0 + $0x48] sm:$0xff]  ;;  %v37_v10 = vld [vmem:[%s2081_s0 + $0x40] sm:$0xff] }
   0x7   :  { %v78_v33 = vcvt.s32.f32 %v1393_v23  ;;  %v81_v37 = vcvt.s32.f32 %v1399_v28  ;;  %v1405_v38 = vcvt.f32.s32 %v1404_v29  ;;  %v1403_v39 = vcvt.f32.s32 %v1402_v30  ;;  %v40_v17 = vld [vmem:[%s2081_s0 + $0x58] sm:$0xff]  ;;  %v39_v18 = vld [vmem:[%s2081_s0 + $0x50] sm:$0xff]  ;;  %v42_v23 = vld [vmem:[%s2081_s0 + $0x68] sm:$0xff] }
   0x8   :  { %v95_v31 = vsub.f32 %v79_v20, %v47_v9  ;;  %v93_v32 = vsub.f32 %v77_v21, %v45_v15  ;;  %v82_v34 = vcvt.s32.f32 %v1401_v24  ;;  %v96_v36 = vsub.f32 %v80_v25, %v48_v22  ;;  %v54_v28 = vld [vmem:[%s2082_s1 + $0x48] sm:$0xff] }
   0x9   :  { %v94_v42 = vsub.f32 %v78_v33, %v46_v26  ;;  %v97_v47 = vsub.f32 %v81_v37, %v49_v35  ;;  %v84_v48 = vcvt.s32.f32 %v1405_v38  ;;  %v83_v49 = vcvt.s32.f32 %v1403_v39 }
   0xa   :  { %v1426_v40 = vtrunc.f32 %v95_v31  ;;  %v1422_v41 = vtrunc.f32 %v93_v32  ;;  %v98_v43 = vsub.f32 %v82_v34, %v50_v27  ;;  %v1428_v46 = vtrunc.f32 %v96_v36  ;;  %v53_v34 = vld [vmem:[%s2082_s1 + $0x40] sm:$0xff] }
   0xb   :  { %v1424_v52 = vtrunc.f32 %v94_v42  ;;  %v1430_v55 = vtrunc.f32 %v97_v47  ;;  %v100_v56 = vsub.f32 %v84_v48, %v52_v44  ;;  %v99_v57 = vsub.f32 %v83_v49, %v51_v45  ;;  %v44_v44 = vld [vmem:[%s2081_s0 + $0x78] sm:$0xff]  ;;  %v55_v49 = vld [vmem:[%s2082_s1 + $0x50] sm:$0xff] }
   0xc   :  { %v1427_v50 = vcvt.f32.s32 %v1426_v40  ;;  %v1423_v51 = vcvt.f32.s32 %v1422_v41  ;;  %v1432_v53 = vtrunc.f32 %v98_v43  ;;  %v1429_v54 = vcvt.f32.s32 %v1428_v46  ;;  %v56_v41 = vld [vmem:[%s2082_s1 + $0x58] sm:$0xff]  ;;  %v41_v43 = vld [vmem:[%s2081_s0 + $0x60] sm:$0xff] }
   0xd   :  { %v1425_v58 = vcvt.f32.s32 %v1424_v52  ;;  %v1431_v62 = vcvt.f32.s32 %v1430_v55  ;;  %v1436_v14 = vtrunc.f32 %v100_v56  ;;  %v1434_v15 = vtrunc.f32 %v99_v57  ;;  %v58_v57 = vld [vmem:[%s2082_s1 + $0x68] sm:$0xff] }
   0xe   :  { %vm129_vm0 = vcmp.gt.s32.totalorder %v1427_v50, 4294967246  ;;  %vm125_vm1 = vcmp.gt.s32.totalorder %v1423_v51, 4294967246  ;;  %v1433_v59 = vcvt.f32.s32 %v1432_v53  ;;  %vm131_vm2 = vcmp.gt.s32.totalorder %v1429_v54, 4294967246 }
   0xf   :  { %v130_v60 = vsel %vm129_vm0, %v1427_v50, 4294967246  ;;  %v126_v61 = vsel %vm125_vm1, %v1423_v51, 4294967246  ;;  %v132_v63 = vsel %vm131_vm2, %v1429_v54, 4294967246  ;;  %vm127_vm5 = vcmp.gt.s32.totalorder %v1425_v58, 4294967246  ;;  %v43_v50 = vld [vmem:[%s2081_s0 + $0x70] sm:$0xff] }
  0x10   :  { %vm161_vm3 = vcmp.lt.s32.totalorder %v130_v60, 50  ;;  %vm157_vm4 = vcmp.lt.s32.totalorder %v126_v61, 50  ;;  %vm163_vm6 = vcmp.lt.s32.totalorder %v132_v63, 50  ;;  %v128_v3 = vsel %vm127_vm5, %v1425_v58, 4294967246 }
  0x11   :  { %v162_v1 = vsel %vm161_vm3, %v130_v60, 50  ;;  %v158_v2 = vsel %vm157_vm4, %v126_v61, 50  ;;  %v164_v6 = vsel %vm163_vm6, %v132_v63, 50  ;;  %vm159_vm7 = vcmp.lt.s32.totalorder %v128_v3, 50 }
  0x12   :  { %v1569_v4 = vadd.s32 50, %v162_v1  ;;  %v1571_v5 = vadd.s32 50, %v158_v2  ;;  %v1576_v8 = vadd.s32 50, %v164_v6  ;;  %v160_v9 = vsel %vm159_vm7, %v128_v3, 50 }
  0x13   :  { %vm135_vm8 = vcmp.gt.s32.totalorder %v1433_v59, 4294967246  ;;  %vm133_vm9 = vcmp.gt.s32.totalorder %v1431_v62, 4294967246  ;;  %v1583_v11 = vadd.s32 50, %v160_v9  ;;  %v1408_v16 = vtrunc.f32 %v38_v7 }
  0x14   :  { %214 = vperm.xlu1 %1462, %v1569_v4   ;;  %208 = vperm.xlu0 %1461, %v1571_v5   ;;  %v136_v12 = vsel %vm135_vm8, %v1433_v59, 4294967246  ;;  %v134_v13 = vsel %vm133_vm9, %v1431_v62, 4294967246  ;;  %v1437_v21 = vcvt.f32.s32 %v1436_v14  ;;  %v1406_v22 = vtrunc.f32 %v37_v10  ;;  %v57_v10 = vld [vmem:[%s2082_s1 + $0x60] sm:$0xff] }
  0x15   :  { %vm167_vm10 = vcmp.lt.s32.totalorder %v136_v12, 50  ;;  %vm165_vm11 = vcmp.lt.s32.totalorder %v134_v13, 50  ;;  %v1435_v26 = vcvt.f32.s32 %v1434_v15  ;;  %v1409_v27 = vcvt.f32.s32 %v1408_v16 }
  0x16   :  { %v168_v19 = vsel %vm167_vm10, %v136_v12, 50  ;;  %v166_v20 = vsel %vm165_vm11, %v134_v13, 50  ;;  %vm139_vm12 = vcmp.gt.s32.totalorder %v1437_v21, 4294967246  ;;  %v1407_v29 = vcvt.f32.s32 %v1406_v22 }
  0x17   :  { %v1594_v24 = vadd.s32 50, %v168_v19  ;;  %v1596_v25 = vadd.s32 50, %v166_v20  ;;  %v1412_v30 = vtrunc.f32 %v40_v17  ;;  %v1410_v31 = vtrunc.f32 %v39_v18 }
  0x18   :  { %217 = vperm.xlu1 %1462, %v1576_v8   ;;  %211 = vperm.xlu0 %1461, %v1583_v11   ;;  %v140_v32 = vsel %vm139_vm12, %v1437_v21, 4294967246  ;;  %vm137_vm13 = vcmp.gt.s32.totalorder %v1435_v26, 4294967246  ;;  %v86_v33 = vcvt.s32.f32 %v1409_v27  ;;  %v1416_v35 = vtrunc.f32 %v42_v23 }
  0x19   :  { %vm171_vm14 = vcmp.lt.s32.totalorder %v140_v32, 50  ;;  %v138_v36 = vsel %vm137_vm13, %v1435_v26, 4294967246  ;;  %v85_v37 = vcvt.s32.f32 %v1407_v29  ;;  %v1413_v38 = vcvt.f32.s32 %v1412_v30  ;;  %v60_v29 = vld [vmem:[%s2082_s1 + $0x78] sm:$0xff]  ;;  %v59_v30 = vld [vmem:[%s2082_s1 + $0x70] sm:$0xff] }
  0x1a   :  { %v172_v39 = vsel %vm171_vm14, %v140_v32, 50  ;;  %vm169_vm15 = vcmp.lt.s32.totalorder %v138_v36, 50  ;;  %v102_v40 = vsub.f32 %v86_v33, %v54_v28  ;;  %v1411_v42 = vcvt.f32.s32 %v1410_v31  ;;  %v400_v31 = vld [vmem:[%s2083_s4 + $0x8] sm:$0xff] }
  0x1b   :  { %v1617_v45 = vadd.s32 50, %v172_v39  ;;  %v170_v46 = vsel %vm169_vm15, %v138_v36, 50  ;;  %v101_v47 = vsub.f32 %v85_v37, %v53_v34  ;;  %v88_v48 = vcvt.s32.f32 %v1413_v38  ;;  %v399_v36 = vld [vmem:[%s2083_s4] sm:$0xff]  ;;  %v401_v37 = vld [vmem:[%s2083_s4 + $0x10] sm:$0xff] }
  0x1c   :  { %223 = vperm.xlu1 %1462, %v1594_v24   ;;  %220 = vperm.xlu0 %1461, %v1596_v25   ;;  %v1625_v51 = vadd.s32 50, %v170_v46  ;;  %v1440_v52 = vtrunc.f32 %v102_v40  ;;  %v87_v53 = vcvt.s32.f32 %v1411_v42  ;;  %v1417_v54 = vcvt.f32.s32 %v1416_v35  ;;  %v402_v35 = vld [vmem:[%s2083_s4 + $0x18] sm:$0xff] }
  0x1d   :  { %v1438_v55 = vtrunc.f32 %v101_v47  ;;  %v104_v56 = vsub.f32 %v88_v48, %v56_v41  ;;  %v1414_v58 = vtrunc.f32 %v41_v43  ;;  %v1420_v59 = vtrunc.f32 %v44_v44  ;;  %v404_v41 = vld [vmem:[%s2083_s4 + $0x28] sm:$0xff]  ;;  %v406_v42 = vld [vmem:[%s2083_s4 + $0x38] sm:$0xff] }
  0x1e   :  { %v1441_v60 = vcvt.f32.s32 %v1440_v52  ;;  %v103_v61 = vsub.f32 %v87_v53, %v55_v49  ;;  %v90_v62 = vcvt.s32.f32 %v1417_v54  ;;  %v1418_v63 = vtrunc.f32 %v43_v50  ;;  %v403_v52 = vld [vmem:[%s2083_s4 + $0x20] sm:$0xff]  ;;  %v405_v53 = vld [vmem:[%s2083_s4 + $0x30] sm:$0xff] }
  0x1f   :  { %v1439_v1 = vcvt.f32.s32 %v1438_v55  ;;  %v1444_v2 = vtrunc.f32 %v104_v56  ;;  %v1415_v3 = vcvt.f32.s32 %v1414_v58  ;;  %v1421_v6 = vcvt.f32.s32 %v1420_v59  ;;  %v410_v58 = vld [vmem:[%s2083_s4 + $0x58] sm:$0xff] }
  0x20   :  { %229 = vperm.xlu1 %1462, %v1617_v45   ;;  %226 = vperm.xlu0 %1461, %v1625_v51   ;;  %vm143_vm0 = vcmp.gt.s32.totalorder %v1441_v60, 4294967246  ;;  %v1442_v7 = vtrunc.f32 %v103_v61  ;;  %v106_v9 = vsub.f32 %v90_v62, %v58_v57  ;;  %v1419_v12 = vcvt.f32.s32 %v1418_v63  ;;  %v408_v57 = vld [vmem:[%s2083_s4 + $0x48] sm:$0xff] }
  0x21   :  { %v144_v13 = vsel %vm143_vm0, %v1441_v60, 4294967246  ;;  %vm141_vm1 = vcmp.gt.s32.totalorder %v1439_v1, 4294967246  ;;  %v1445_v14 = vcvt.f32.s32 %v1444_v2  ;;  %v89_v15 = vcvt.s32.f32 %v1415_v3 }
  0x22   :  { %vm175_vm2 = vcmp.lt.s32.totalorder %v144_v13, 50  ;;  %v142_v16 = vsel %vm141_vm1, %v1439_v1, 4294967246  ;;  %v1443_v17 = vcvt.f32.s32 %v1442_v7  ;;  %v1448_v18 = vtrunc.f32 %v106_v9  ;;  %v409_v7 = vld [vmem:[%s2083_s4 + $0x50] sm:$0xff] }
  0x23   :  { %v176_v19 = vsel %vm175_vm2, %v144_v13, 50  ;;  %vm173_vm3 = vcmp.lt.s32.totalorder %v142_v16, 50  ;;  %vm147_vm4 = vcmp.gt.s32.totalorder %v1445_v14, 4294967246  ;;  %v105_v20 = vsub.f32 %v89_v15, %v57_v10  ;;  %v412_v10 = vld [vmem:[%s2083_s4 + $0x68] sm:$0xff] }
  0x24   :  { %v1635_v21 = vadd.s32 50, %v176_v19  ;;  %v174_v22 = vsel %vm173_vm3, %v142_v16, 50  ;;  %v148_v23 = vsel %vm147_vm4, %v1445_v14, 4294967246  ;;  %vm145_vm5 = vcmp.gt.s32.totalorder %v1443_v17, 4294967246  ;;  %v413_v19 = vld [vmem:[%s2083_s4 + $0x70] sm:$0xff] }
  0x25   :  { %v1637_v26 = vadd.s32 50, %v174_v22  ;;  %vm179_vm6 = vcmp.lt.s32.totalorder %v148_v23, 50  ;;  %v146_v27 = vsel %vm145_vm5, %v1443_v17, 4294967246  ;;  %v1449_v28 = vcvt.f32.s32 %v1448_v18  ;;  %v411_v18 = vld [vmem:[%s2083_s4 + $0x60] sm:$0xff] }
  0x26   :  { %235 = vperm.xlu1 %1462, %v1635_v21   ;;  %v180_v32 = vsel %vm179_vm6, %v148_v23, 50  ;;  %vm177_vm7 = vcmp.lt.s32.totalorder %v146_v27, 50  ;;  %v1446_v33 = vtrunc.f32 %v105_v20  ;;  %v92_v34 = vcvt.s32.f32 %v1421_v6  ;;  %v407_v6 = vld [vmem:[%s2083_s4 + $0x40] sm:$0xff]  ;;  %v416_v23 = vld [vmem:[%s2083_s4 + $0x88] sm:$0xff] }
  0x27   :  { %232 = vperm.xlu0 %1461, %v1637_v26   ;;  %v1659_v38 = vadd.s32 50, %v180_v32  ;;  %v178_v39 = vsel %vm177_vm7, %v146_v27, 50  ;;  %vm151_vm8 = vcmp.gt.s32.totalorder %v1449_v28, 4294967246  ;;  %v91_v40 = vcvt.s32.f32 %v1419_v12  ;;  %v414_v12 = vld [vmem:[%s2083_s4 + $0x78] sm:$0xff]  ;;  %v415_v32 = vld [vmem:[%s2083_s4 + $0x80] sm:$0xff] }
  0x28   :  { %v1667_v43 = vadd.s32 50, %v178_v39  ;;  %v152_v44 = vsel %vm151_vm8, %v1449_v28, 4294967246  ;;  %v1447_v46 = vcvt.f32.s32 %v1446_v33  ;;  %v108_v47 = vsub.f32 %v92_v34, %v60_v29  ;;  %v418_v27 = vld [vmem:[%s2083_s4 + $0x98] sm:$0xff]  ;;  %v417_v33 = vld [vmem:[%s2083_s4 + $0x90] sm:$0xff]  ;;  %v420_v34 = vld [vmem:[%s2083_s4 + $0xa8] sm:$0xff] }
  0x29   :  { %vm183_vm9 = vcmp.lt.s32.totalorder %v152_v44, 50  ;;  %v107_v48 = vsub.f32 %v91_v40, %v59_v30  ;;  %v1286_v49 = vpack.c.bf16 %v402_v35, %v400_v31  ;;  %v1288_v50 = vpack.c.bf16 %v401_v37, %v399_v36  ;;  %v422_v35 = vld [vmem:[%s2083_s4 + $0xb8] sm:$0xff]  ;;  %v419_v39 = vld [vmem:[%s2083_s4 + $0xa0] sm:$0xff]  ;;  %v421_v40 = vld [vmem:[%s2083_s4 + $0xb0] sm:$0xff] }
  0x2a   :  { %241 = vperm.xlu1 %1462, %v1659_v38   ;;  %v184_v54 = vsel %vm183_vm9, %v152_v44, 50  ;;  %vm149_vm10 = vcmp.gt.s32.totalorder %v1447_v46, 4294967246  ;;  %v1452_v55 = vtrunc.f32 %v108_v47  ;;  %v1290_v56 = vpack.c.bf16 %v406_v42, %v404_v41  ;;  %v424_v41 = vld [vmem:[%s2083_s4 + $0xc8] sm:$0xff]  ;;  %v426_v42 = vld [vmem:[%s2083_s4 + $0xd8] sm:$0xff]  ;;  %v423_v47 = vld [vmem:[%s2083_s4 + $0xc0] sm:$0xff] }
  0x2b   :  { %238 = vperm.xlu0 %1461, %v1667_v43   ;;  %v1683_v59 = vadd.s32 50, %v184_v54  ;;  %v150_v60 = vsel %vm149_vm10, %v1447_v46, 4294967246  ;;  %v1450_v61 = vtrunc.f32 %v107_v48  ;;  %1287 = vmatprep.subr.bf16.mxu0 %v1286_v49  ;;  %v1292_v63 = vpack.c.bf16 %v405_v53, %v403_v52  ;;  %v425_v48 = vld [vmem:[%s2083_s4 + $0xd0] sm:$0xff]  ;;  %v430_v52 = vld [vmem:[%s2083_s4 + $0xf8] sm:$0xff] }
  0x2c   :  { %vm181_vm11 = vcmp.lt.s32.totalorder %v150_v60, 50  ;;  %v1453_v62 = vcvt.f32.s32 %v1452_v55  ;;  %1289 = vmatpush1.bf16.msra.mxu0 %v1288_v50  ;;  %v1294_v3 = vpack.c.bf16 %v410_v58, %v408_v57  ;;  %v1296_v15 = vpack.c.bf16 %v409_v7, %v407_v6  ;;  %v428_v50 = vld [vmem:[%s2083_s4 + $0xe8] sm:$0xff]  ;;  %v427_v55 = vld [vmem:[%s2083_s4 + $0xe0] sm:$0xff] }
  0x2d   :  { %v182_v1 = vsel %vm181_vm11, %v150_v60, 50  ;;  %v1451_v2 = vcvt.f32.s32 %v1450_v61  ;;  %1291 = vmatprep.subr.bf16.mxu0 %v1290_v56  ;;  %v1298_v17 = vpack.c.bf16 %v414_v12, %v412_v10  ;;  %v1468_v29 = vmov 0.0   ;;  %v429_v56 = vld [vmem:[%s2083_s4 + $0xf0] sm:$0xff] }
  0x2e   :  { %247 = vperm.xlu1 %1462, %v1683_v59   ;;  %v1692_v9 = vadd.s32 50, %v182_v1  ;;  %vm155_vm12 = vcmp.gt.s32.totalorder %v1453_v62, 4294967246  ;;  %495 = vmatprep.mubr.f32.mxu0 %v1468_v29  ;;  %v1300_v30 = vpack.c.bf16 %v413_v19, %v411_v18  ;;  %v1302_v31 = vpack.c.bf16 %v418_v27, %v416_v23 }
  0x2f   :  { %v156_v13 = vsel %vm155_vm12, %v1453_v62, 4294967246  ;;  %vm153_vm13 = vcmp.gt.s32.totalorder %v1451_v2, 4294967246  ;;  %v1304_v36 = vpack.c.bf16 %v417_v33, %v415_v32  ;;  %v1306_v37 = vpack.c.bf16 %v422_v35, %v420_v34 }
  0x30   :  { %244 = vperm.xlu0 %1461, %v1692_v9   ;;  %vm187_vm14 = vcmp.lt.s32.totalorder %v156_v13, 50  ;;  %v154_v14 = vsel %vm153_vm13, %v1451_v2, 4294967246  ;;  %1293 = vmatpush1.bf16.msra.mxu0 %v1292_v63  ;;  %v1308_v44 = vpack.c.bf16 %v421_v40, %v419_v39  ;;  %v1310_v46 = vpack.c.bf16 %v426_v42, %v424_v41  ;;  %v989_v39 = vld [vmem:[%s2086_s5] sm:$0xff] }
  0x31   :  { %v188_v16 = vsel %vm187_vm14, %v156_v13, 50  ;;  %vm185_vm15 = vcmp.lt.s32.totalorder %v154_v14, 50  ;;  %1295 = vmatprep.subr.bf16.mxu0 %v1294_v3  ;;  %v1469_v49 = vmov 0   ;;  %v1312_v53 = vpack.c.bf16 %v425_v48, %v423_v47  ;;  %v990_v47 = vld [vmem:[%s2087_s6] sm:$0xff]  ;;  %s1473_s6 = smov 1  }
  0x32   :  { %v204_v20 = vadd.s32 50, %v188_v16  ;;  %v186_v22 = vsel %vm185_vm15, %v154_v14, 50  ;;  %v1314_v54 = vpack.c.bf16 %v430_v52, %v428_v50  ;;  %v1471_v48 = vmov 0.0|0.0  }
  0x33   :  { %v203_v28 = vadd.s32 50, %v186_v22  ;;  %1318 = vmatprep.subr.bf16.mxu1 %v1471_v48  ;;  %v996_v52 = vmul.f32 %v990_v47, %v990_v47 }
  0x34   :  { %253 = vperm.xlu1 %1462, %v204_v20   ;;  %1297 = vmatpush1.bf16.msra.mxu0 %v1296_v15 }
  0x35   :  { %250 = vperm.xlu0 %1461, %v203_v28   ;;  %1299 = vmatprep.subr.bf16.mxu0 %v1298_v17 }
  0x38   :  { %1301 = vmatpush1.bf16.msra.mxu0 %v1300_v30  ;;  %1464 = vset.pattern.permute.xlu1 %v1469_v49 }
  0x39   :  { %1303 = vmatprep.subr.bf16.mxu0 %v1302_v31  ;;  %307 = vperm.xlu1 %1464, %v1583_v11   ;;  %v1316_v11 = vpack.c.bf16 %v429_v56, %v427_v55  ;;  %v969_v31 = vld [vmem:[%s2085_s3] sm:$0x3] }
  0x3a   :  { %1463 = vset.pattern.permute.xlu0 %v1469_v49 }
  0x3b   :  { %304 = vperm.xlu0 %1463, %v1571_v5   ;;  %v205_v5 = vlaneseq }
  0x3c   :  { %1305 = vmatpush1.bf16.msra.mxu0 %v1304_v36 }
  0x3d   :  { %1307 = vmatprep.subr.bf16.mxu0 %v1306_v37  ;;  %310 = vperm.xlu1 %1464, %v1569_v4   ;;  %v1773_v4 = vld [vmem:[%s2084_s2] sm:$0xff]  ;;  %v1857_v22 = vshrl.u32 %v205_v5, 7 }
  0x3f   :  { %313 = vperm.xlu0 %1463, %v1576_v8   ;;  %v1779_v8 = vand.u32 127, %v205_v5  ;;  %v982_v30 = vsub.s32 0, %v1857_v22 }
  0x40   :  { %1309 = vmatpush1.bf16.msra.mxu0 %v1308_v44 }
  0x41   :  { %1311 = vmatprep.subr.bf16.mxu0 %v1310_v46  ;;  %316 = vperm.xlu1 %1464, %v1596_v25   ;;  %v983_v33 = vrot.slane %v969_v31, %v982_v30 }
  0x43   :  { %319 = vperm.xlu0 %1463, %v1594_v24  }
  0x44   :  { %1313 = vmatpush1.bf16.msra.mxu0 %v1312_v53 }
  0x45   :  { %1315 = vmatprep.subr.bf16.mxu0 %v1314_v54  ;;  %322 = vperm.xlu1 %1464, %v1625_v51  }
  0x47   :  { %325 = vperm.xlu0 %1463, %v1617_v45   ;;  %v1470_v45 = vmov 1.0  }
  0x48   :  { %1317 = vmatpush1.bf16.msra.mxu0 %v1316_v11 }
  0x49   :  { %328 = vperm.xlu1 %1464, %v1637_v26   ;;  %1366 = vmatprep.subr.bf16.mxu0 %v1471_v48 }
  0x4b   :  { %331 = vperm.xlu0 %1463, %v1635_v21  }
  0x4d   :  { %334 = vperm.xlu1 %1464, %v1667_v43  }
  0x4f   :  { %337 = vperm.xlu0 %1463, %v1659_v38  }
  0x51   :  { %340 = vperm.xlu1 %1464, %v1692_v9  }
  0x53   :  { %343 = vperm.xlu0 %1463, %v1683_v59  }
  0x55   :  { %346 = vperm.xlu1 %1464, %v203_v28   ;;  %v972_v28 = vsub.s32 1, %v1857_v22 }
  0x57   :  { %349 = vperm.xlu0 %1463, %v204_v20   ;;  %v973_v32 = vrot.slane %v969_v31, %v972_v28 }
  0x59   :  { %1465 = vset.pattern.permute.xlu1 %v1467_v0 }
  0x5a   :  { %976 = vperm.xlu1 %1465, %v1773_v4  }
  0x5b   :  { %985 = vperm.xlu0 %1463, %v1773_v4  }
  0x93   :  { %v215_v24 = vpop.permute.xlu1 %214  ;;  %v209_v25 = vpop.permute.xlu0 %208 }
  0x94   :  { %vm255_vm0 = vcmp.eq.s32.totalorder %v209_v25, %v1779_v8  ;;  %vm257_vm2 = vcmp.eq.s32.totalorder %v215_v24, %v1779_v8 }
  0x95   :  { %1075 = vmatmul.mubr.msk.f32.vlgmr.msra.gmra.mrb[0].mxu0 %vm255_vm0, %v1470_v45  ;;  %vm1003_vm0 = vcmask 64512  }
  0x96   :  { %501 = vmatprep.mubr.f32.mxu0 %v1468_v29 }
  0x97   :  { %v218_v51 = vpop.permute.xlu1 %217  ;;  %v212_v21 = vpop.permute.xlu0 %211 }
  0x98   :  { %vm256_vm1 = vcmp.eq.s32.totalorder %v212_v21, %v1779_v8  ;;  %vm258_vm3 = vcmp.eq.s32.totalorder %v218_v51, %v1779_v8 }
  0x99   :  { %1076 = vmatmul.mubr.msk.f32.gmra.mrb[2].mxu0 %vm256_vm1, %v1470_v45  ;;  %vm1472_vm1 = vmmov 0  }
  0x9a   :  { %507 = vmatprep.mubr.f32.mxu0 %v1468_v29  ;;  %1213 = vmatprep.mubr.msk.f32.mxu1 %vm1472_vm1, %v1468_v29 }
  0x9b   :  { %v224_v26 = vpop.permute.xlu1 %223  ;;  %v221_v38 = vpop.permute.xlu0 %220 }
  0x9c   :  { %vm259_vm4 = vcmp.eq.s32.totalorder %v221_v38, %v1779_v8  ;;  %vm260_vm5 = vcmp.eq.s32.totalorder %v224_v26, %v1779_v8 }
  0x9d   :  { %1077 = vmatmul.mubr.msk.f32.gmra.mrb[4].mxu0 %vm257_vm2, %v1470_v45 }
  0x9e   :  { %513 = vmatprep.mubr.f32.mxu0 %v1468_v29 }
  0x9f   :  { %v230_v43 = vpop.permute.xlu1 %229  ;;  %v227_v57 = vpop.permute.xlu0 %226 }
  0xa0   :  { %vm261_vm6 = vcmp.eq.s32.totalorder %v227_v57, %v1779_v8  ;;  %vm262_vm7 = vcmp.eq.s32.totalorder %v230_v43, %v1779_v8 }
  0xa1   :  { %1078 = vmatmul.mubr.msk.f32.gmra.mrb[6].mxu0 %vm258_vm3, %v1470_v45 }
  0xa2   :  { %519 = vmatprep.mubr.f32.mxu0 %v1468_v29 }
  0xa5   :  { %1079 = vmatmul.mubr.msk.f32.gmra.mrb[8].mxu0 %vm259_vm4, %v1470_v45  ;;  %v236_v58 = vpop.permute.xlu1 %235 }
  0xa6   :  { %525 = vmatprep.mubr.f32.mxu0 %v1468_v29  ;;  %v233_v59 = vpop.permute.xlu0 %232  ;;  %vm264_vm9 = vcmp.eq.s32.totalorder %v236_v58, %v1779_v8 }
  0xa7   :  { %vm263_vm8 = vcmp.eq.s32.totalorder %v233_v59, %v1779_v8 }
  0xa9   :  { %1080 = vmatmul.mubr.msk.f32.gmra.mrb[10].mxu0 %vm260_vm5, %v1470_v45  ;;  %v242_v60 = vpop.permute.xlu1 %241 }
  0xaa   :  { %531 = vmatprep.mubr.f32.mxu0 %v1468_v29  ;;  %v239_v61 = vpop.permute.xlu0 %238  ;;  %vm266_vm11 = vcmp.eq.s32.totalorder %v242_v60, %v1779_v8 }
  0xab   :  { %vm265_vm10 = vcmp.eq.s32.totalorder %v239_v61, %v1779_v8 }
  0xad   :  { %1081 = vmatmul.mubr.msk.f32.gmra.mrb[12].mxu0 %vm261_vm6, %v1470_v45  ;;  %v248_v62 = vpop.permute.xlu1 %247 }
  0xae   :  { %537 = vmatprep.mubr.f32.mxu0 %v1468_v29  ;;  %vm268_vm13 = vcmp.eq.s32.totalorder %v248_v62, %v1779_v8 }
  0xaf   :  { %v245_v63 = vpop.permute.xlu0 %244 }
  0xb0   :  { %vm267_vm12 = vcmp.eq.s32.totalorder %v245_v63, %v1779_v8 }
  0xb1   :  { %1082 = vmatmul.mubr.msk.f32.gmra.mrb[14].mxu0 %vm262_vm7, %v1470_v45 }
  0xb2   :  { %543 = vmatprep.mubr.f32.mxu0 %v1468_v29 }
  0xb3   :  { %v254_v1 = vpop.permute.xlu1 %253 }
  0xb4   :  { %v251_v2 = vpop.permute.xlu0 %250  ;;  %vm270_vm15 = vcmp.eq.s32.totalorder %v254_v1, %v1779_v8 }
  0xb5   :  { %1083 = vmatmul.mubr.msk.f32.gmra.mrb[16].mxu0 %vm263_vm8, %v1470_v45  ;;  %vm269_vm14 = vcmp.eq.s32.totalorder %v251_v2, %v1779_v8 }
  0xb6   :  { %549 = vmatprep.mubr.f32.mxu0 %v1468_v29 }
  0xb8   :  { %v1814_v3 = vpop.permute.xlu1 %307 }
  0xb9   :  { %1084 = vmatmul.mubr.msk.f32.gmra.mrb[18].mxu0 %vm264_vm9, %v1470_v45  ;;  %vm352_vm3 = vcmp.eq.s32.totalorder %v1814_v3, %v1779_v8 }
  0xba   :  { %555 = vmatprep.mubr.f32.mxu0 %v1468_v29  ;;  %v1816_v6 = vpop.permute.xlu0 %304  ;;  %v1060_v26 = vsel %vm352_vm3, 1.0, %v1468_v29 }
  0xbb   :  { %vm351_vm2 = vcmp.eq.s32.totalorder %v1816_v6, %v1779_v8 }
  0xbc   :  { %v1821_v7 = vpop.permute.xlu1 %310  ;;  %v1059_v5 = vsel %vm351_vm2, 1.0, %v1468_v29 }
  0xbd   :  { %1085 = vmatmul.mubr.msk.f32.gmra.mrb[20].mxu0 %vm265_vm10, %v1470_v45  ;;  %vm353_vm4 = vcmp.eq.s32.totalorder %v1821_v7, %v1779_v8 }
  0xbe   :  { %561 = vmatprep.mubr.f32.mxu0 %v1468_v29  ;;  %v1823_v9 = vpop.permute.xlu0 %313  ;;  %v1061_v62 = vsel %vm353_vm4, 1.0, %v1468_v29 }
  0xbf   :  { %vm354_vm7 = vcmp.eq.s32.totalorder %v1823_v9, %v1779_v8 }
  0xc0   :  { %v1828_v10 = vpop.permute.xlu1 %316  ;;  %v1062_v9 = vsel %vm354_vm7, 1.0, %v1468_v29 }
  0xc1   :  { %1086 = vmatmul.mubr.msk.f32.gmra.mrb[22].mxu0 %vm266_vm11, %v1470_v45  ;;  %vm355_vm10 = vcmp.eq.s32.totalorder %v1828_v10, %v1779_v8 }
  0xc2   :  { %567 = vmatprep.mubr.f32.mxu0 %v1468_v29  ;;  %v1830_v12 = vpop.permute.xlu0 %319 }
  0xc4   :  { %v1835_v13 = vpop.permute.xlu1 %322 }
  0xc5   :  { %1087 = vmatmul.mubr.msk.f32.gmra.mrb[24].mxu0 %vm267_vm12, %v1470_v45 }
  0xc6   :  { %573 = vmatprep.mubr.f32.mxu0 %v1468_v29  ;;  %v1837_v14 = vpop.permute.xlu0 %325 }
  0xc7   :  { %vm358_vm4 = vcmp.eq.s32.totalorder %v1837_v14, %v1779_v8 }
  0xc8   :  { %v1842_v15 = vpop.permute.xlu1 %328  ;;  %v1066_v14 = vsel %vm358_vm4, 1.0, %v1468_v29 }
  0xc9   :  { %1088 = vmatmul.mubr.msk.f32.gmra.mrb[26].mxu0 %vm268_vm13, %v1470_v45  ;;  %vm356_vm13 = vcmp.eq.s32.totalorder %v1830_v12, %v1779_v8  ;;  %vm359_vm7 = vcmp.eq.s32.totalorder %v1842_v15, %v1779_v8 }
  0xca   :  { %579 = vmatprep.mubr.f32.mxu0 %v1468_v29  ;;  %v1844_v16 = vpop.permute.xlu0 %331  ;;  %v1064_v12 = vsel %vm356_vm13, 1.0, %v1468_v29 }
  0xcc   :  { %v1848_v17 = vpop.permute.xlu1 %334 }
  0xcd   :  { %1089 = vmatmul.mubr.msk.f32.gmra.mrb[28].mxu0 %vm269_vm14, %v1470_v45 }
  0xce   :  { %585 = vmatprep.mubr.f32.mxu0 %v1468_v29  ;;  %v1850_v18 = vpop.permute.xlu0 %337 }
  0xd0   :  { %v1852_v19 = vpop.permute.xlu1 %340 }
  0xd1   :  { %1090 = vmatmul.mubr.msk.f32.gmra.mrb[30].mxu0 %vm270_vm15, %v1470_v45 }
  0xd2   :  { %v1854_v20 = vpop.permute.xlu0 %343  ;;  %1283 = vmatprep.mubr.msk.f32.mxu0 %vm1472_vm1, %v1468_v29 }
  0xd4   :  { %v1859_v23 = vpop.permute.xlu1 %346 }
  0xd6   :  { %v1861_v27 = vpop.permute.xlu0 %349 }
  0xd9   :  { %v977_v34 = vpop.permute.xlu1 %976 }
  0xda   :  { %v986_v35 = vpop.permute.xlu0 %985  ;;  %v979_v36 = vsub.f32 %v973_v32, %v977_v34 }
  0xdb   :  { %v988_v37 = vsub.f32 %v983_v33, %v986_v35 }
  0xdc   :  { %v991_v40 = vmul.f32 %v989_v39, %v979_v36  ;;  %v998_v49 = vmul.f32 4.0, %v979_v36 }
  0xdd   :  { %v992_v41 = vmul.f32 %v989_v39, %v988_v37  ;;  %v1000_v50 = vmul.f32 4.0, %v988_v37 }
  0xde   :  { %v993_v42 = vmul.f32 %v991_v40, %v991_v40 }
  0xdf   :  { %v994_v44 = vmul.f32 %v992_v41, %v992_v41  ;;  %v1063_v41 = vsel %vm355_vm10, 1.0, %v1468_v29 }
  0xe1   :  { %v995_v46 = vadd.f32 %v994_v44, %v993_v42 }
  0xe3   :  { %v997_v53 = vsub.f32 %v995_v46, %v996_v52 }
  0xe5   :  { %v999_v54 = vmul.f32 %v998_v49, %v997_v53  ;;  %v1001_v55 = vmul.f32 %v1000_v50, %v997_v53 }
  0xe7   :  { %v1004_v56 = vsel %vm1003_vm0, %v999_v54, 0.0  ;;  %v1008_v11 = vsel %vm1003_vm0, %v1001_v55, 0.0  ;;  %vm357_vm0 = vcmp.eq.s32.totalorder %v1835_v13, %v1779_v8 }
  0xe8   :  { %1005 = vadd.xlane.f32.xlu1 %v1004_v56 }
  0xec   :  { %1009 = vadd.xlane.f32.xlu1 %v1008_v11 }
 0x168   :  { %v497_v24 = vpop.f32.mrb[0].mxu0 }
 0x169   :  { %v592_v25 = vmul.f32 %v1059_v5, %v497_v24  ;;  %v499_v51 = vpop.f32.mrb[1].mxu0 }
 0x16a   :  { %v1885_v21 = vmul.f32 %v1059_v5, %v499_v51 }
 0x16b   :  { %vm624_vm5 = vcmp.ne.f32.partialorder %v592_v25, 0.0 }
 0x16c   :  { %v1091_v38 = vsel %vm624_vm5, 1.0, %v1468_v29  ;;  %vm672_vm6 = vcmp.ne.f32.partialorder %v1885_v21, 0.0  ;;  %v503_v43 = vpop.f32.mrb[2].mxu0 }
 0x16d   :  { %v1107_v57 = vsel %vm672_vm6, 1.0, %v1468_v29  ;;  %v593_v58 = vmul.f32 %v1060_v26, %v503_v43  ;;  %v505_v59 = vpop.f32.mrb[3].mxu0 }
 0x16e   :  { %v720_v60 = vadd.f32 %v1107_v57, %v1091_v38  ;;  %v1893_v61 = vmul.f32 %v1060_v26, %v505_v59  ;;  %v1065_v26 = vsel %vm357_vm0, 1.0, %v1468_v29 }
 0x16f   :  { %vm625_vm8 = vcmp.ne.f32.partialorder %v593_v58, 0.0  ;;  %v1319_v63 = vpack.c.bf16 %v593_v58, %v592_v25 }
 0x170   :  { %v1092_v1 = vsel %vm625_vm8, 1.0, %v1468_v29  ;;  %vm673_vm9 = vcmp.ne.f32.partialorder %v1893_v61, 0.0  ;;  %v1343_v2 = vpack.c.bf16 %v1893_v61, %v1885_v21  ;;  %v509_v3 = vpop.f32.mrb[4].mxu0 }
 0x171   :  { %v1108_v6 = vsel %vm673_vm9, 1.0, %v1468_v29  ;;  %v594_v7 = vmul.f32 %v1061_v62, %v509_v3  ;;  %v511_v28 = vpop.f32.mrb[5].mxu0  ;;  %1320 = vmatpush3.bf16.msra.mxu1 %v1319_v63 }
 0x172   :  { %v721_v30 = vadd.f32 %v1108_v6, %v1092_v1  ;;  %v1903_v31 = vmul.f32 %v1061_v62, %v511_v28  ;;  %1321 = vmatprep.subr.bf16.mxu1 %v1471_v48 }
 0x173   :  { %vm626_vm11 = vcmp.ne.f32.partialorder %v594_v7, 0.0 }
 0x174   :  { %v1367_v32 = vpack.c.bf16 %v721_v30, %v720_v60  ;;  %v1093_v33 = vsel %vm626_vm11, 1.0, %v1468_v29  ;;  %vm674_vm12 = vcmp.ne.f32.partialorder %v1903_v31, 0.0  ;;  %v515_v34 = vpop.f32.mrb[6].mxu0 }
 0x175   :  { %v1109_v35 = vsel %vm674_vm12, 1.0, %v1468_v29  ;;  %v595_v36 = vmul.f32 %v1062_v9, %v515_v34  ;;  %v517_v37 = vpop.f32.mrb[7].mxu0  ;;  %vm360_vm12 = vcmp.eq.s32.totalorder %v1844_v16, %v1779_v8 }
 0x176   :  { %v722_v39 = vadd.f32 %v1109_v35, %v1093_v33  ;;  %v1912_v40 = vmul.f32 %v1062_v9, %v517_v37  ;;  %1368 = vmatpush3.bf16.msra.mxu0 %v1367_v32  ;;  %v1067_v33 = vsel %vm359_vm7, 1.0, %v1468_v29 }
 0x177   :  { %vm627_vm14 = vcmp.ne.f32.partialorder %v595_v36, 0.0  ;;  %v1322_v10 = vpack.c.bf16 %v595_v36, %v594_v7  ;;  %1369 = vmatprep.subr.bf16.mxu0 %v1471_v48 }
 0x178   :  { %v1094_v42 = vsel %vm627_vm14, 1.0, %v1468_v29  ;;  %vm675_vm15 = vcmp.ne.f32.partialorder %v1912_v40, 0.0  ;;  %v1346_v44 = vpack.c.bf16 %v1912_v40, %v1903_v31  ;;  %v521_v46 = vpop.f32.mrb[8].mxu0 }
 0x179   :  { %v1110_v47 = vsel %vm675_vm15, 1.0, %v1468_v29  ;;  %v596_v49 = vmul.f32 %v1063_v41, %v521_v46  ;;  %v523_v50 = vpop.f32.mrb[9].mxu0  ;;  %1323 = vmatpush3.bf16.msra.mxu1 %v1322_v10  ;;  %vm361_vm15 = vcmp.eq.s32.totalorder %v1848_v17, %v1779_v8 }
 0x17a   :  { %v723_v52 = vadd.f32 %v1110_v47, %v1094_v42  ;;  %v1923_v53 = vmul.f32 %v1063_v41, %v523_v50  ;;  %1324 = vmatprep.subr.bf16.mxu1 %v1471_v48  ;;  %v1069_v17 = vsel %vm361_vm15, 1.0, %v1468_v29  ;;  %vm366_vm15 = vcmp.eq.s32.totalorder %v1861_v27, %v1779_v8 }
 0x17b   :  { %vm628_vm2 = vcmp.ne.f32.partialorder %v596_v49, 0.0 }
 0x17c   :  { %v1370_v54 = vpack.c.bf16 %v723_v52, %v722_v39  ;;  %v1095_v55 = vsel %vm628_vm2, 1.0, %v1468_v29  ;;  %vm676_vm3 = vcmp.ne.f32.partialorder %v1923_v53, 0.0  ;;  %v527_v56 = vpop.f32.mrb[10].mxu0 }
 0x17d   :  { %v1111_v11 = vsel %vm676_vm3, 1.0, %v1468_v29  ;;  %v597_v5 = vmul.f32 %v1064_v12, %v527_v56  ;;  %v529_v24 = vpop.f32.mrb[11].mxu0  ;;  %vm362_vm3 = vcmp.eq.s32.totalorder %v1850_v18, %v1779_v8 }
 0x17e   :  { %v724_v25 = vadd.f32 %v1111_v11, %v1095_v55  ;;  %v1932_v51 = vmul.f32 %v1064_v12, %v529_v24  ;;  %1371 = vmatpush3.bf16.msra.mxu0 %v1370_v54 }
 0x17f   :  { %vm629_vm5 = vcmp.ne.f32.partialorder %v597_v5, 0.0  ;;  %v1325_v13 = vpack.c.bf16 %v597_v5, %v596_v49  ;;  %1372 = vmatprep.subr.bf16.mxu0 %v1471_v48  ;;  %v1068_v49 = vsel %vm360_vm12, 1.0, %v1468_v29  ;;  %vm365_vm12 = vcmp.eq.s32.totalorder %v1859_v23, %v1779_v8 }
 0x180   :  { %v1096_v38 = vsel %vm629_vm5, 1.0, %v1468_v29  ;;  %vm677_vm6 = vcmp.ne.f32.partialorder %v1932_v51, 0.0  ;;  %v1349_v43 = vpack.c.bf16 %v1932_v51, %v1923_v53  ;;  %v533_v57 = vpop.f32.mrb[12].mxu0  ;;  %v1073_v23 = vsel %vm365_vm12, 1.0, %v1468_v29  ;;  %v1002_v51 = vld [vmem:[%s2088_s7] sm:$0xff] }
 0x181   :  { %v1112_v58 = vsel %vm677_vm6, 1.0, %v1468_v29  ;;  %v598_v59 = vmul.f32 %v1065_v26, %v533_v57  ;;  %v535_v60 = vpop.f32.mrb[13].mxu0  ;;  %1326 = vmatpush3.bf16.msra.mxu1 %v1325_v13  ;;  %vm363_vm6 = vcmp.eq.s32.totalorder %v1852_v19, %v1779_v8 }
 0x182   :  { %v725_v62 = vadd.f32 %v1112_v58, %v1096_v38  ;;  %v1943_v63 = vmul.f32 %v1065_v26, %v535_v60  ;;  %1327 = vmatprep.subr.bf16.mxu1 %v1471_v48  ;;  %v1070_v60 = vsel %vm362_vm3, 1.0, %v1468_v29  ;;  %v1071_v19 = vsel %vm363_vm6, 1.0, %v1468_v29 }
 0x183   :  { %vm630_vm8 = vcmp.ne.f32.partialorder %v598_v59, 0.0 }
 0x184   :  { %v1373_v1 = vpack.c.bf16 %v725_v62, %v724_v25  ;;  %v1097_v3 = vsel %vm630_vm8, 1.0, %v1468_v29  ;;  %vm678_vm9 = vcmp.ne.f32.partialorder %v1943_v63, 0.0  ;;  %v539_v6 = vpop.f32.mrb[14].mxu0 }
 0x185   :  { %v1113_v7 = vsel %vm678_vm9, 1.0, %v1468_v29  ;;  %v599_v28 = vmul.f32 %v1066_v14, %v539_v6  ;;  %v541_v30 = vpop.f32.mrb[15].mxu0  ;;  %vm364_vm9 = vcmp.eq.s32.totalorder %v1854_v20, %v1779_v8 }
 0x186   :  { %v726_v9 = vadd.f32 %v1113_v7, %v1097_v3  ;;  %v1952_v32 = vmul.f32 %v1066_v14, %v541_v30  ;;  %1374 = vmatpush3.bf16.msra.mxu0 %v1373_v1 }
 0x187   :  { %vm631_vm10 = vcmp.ne.f32.partialorder %v599_v28, 0.0  ;;  %v1328_v34 = vpack.c.bf16 %v599_v28, %v598_v59  ;;  %1375 = vmatprep.subr.bf16.mxu0 %v1471_v48 }
 0x188   :  { %v1098_v15 = vsel %vm631_vm10, 1.0, %v1468_v29  ;;  %vm679_vm11 = vcmp.ne.f32.partialorder %v1952_v32, 0.0  ;;  %v1352_v35 = vpack.c.bf16 %v1952_v32, %v1943_v63  ;;  %v545_v36 = vpop.f32.mrb[16].mxu0 }
 0x189   :  { %v1114_v37 = vsel %vm679_vm11, 1.0, %v1468_v29  ;;  %v600_v39 = vmul.f32 %v1067_v33, %v545_v36  ;;  %v547_v41 = vpop.f32.mrb[17].mxu0  ;;  %1329 = vmatpush3.bf16.msra.mxu1 %v1328_v34 }
 0x18a   :  { %v727_v10 = vadd.f32 %v1114_v37, %v1098_v15  ;;  %v1963_v42 = vmul.f32 %v1067_v33, %v547_v41  ;;  %1330 = vmatprep.subr.bf16.mxu1 %v1471_v48 }
 0x18b   :  { %vm632_vm13 = vcmp.ne.f32.partialorder %v600_v39, 0.0 }
 0x18c   :  { %v1376_v46 = vpack.c.bf16 %v727_v10, %v726_v9  ;;  %v1099_v47 = vsel %vm632_vm13, 1.0, %v1468_v29  ;;  %vm680_vm14 = vcmp.ne.f32.partialorder %v1963_v42, 0.0  ;;  %v551_v50 = vpop.f32.mrb[18].mxu0  ;;  %v1072_v10 = vsel %vm364_vm9, 1.0, %v1468_v29 }
 0x18d   :  { %v1115_v16 = vsel %vm680_vm14, 1.0, %v1468_v29  ;;  %v601_v52 = vmul.f32 %v1068_v49, %v551_v50  ;;  %v553_v12 = vpop.f32.mrb[19].mxu0  ;;  %vm1037_vm9 = vcmask 15360  }
 0x18e   :  { %v728_v54 = vadd.f32 %v1115_v16, %v1099_v47  ;;  %v1972_v55 = vmul.f32 %v1068_v49, %v553_v12  ;;  %1377 = vmatpush3.bf16.msra.mxu0 %v1376_v46 }
 0x18f   :  { %vm633_vm0 = vcmp.ne.f32.partialorder %v601_v52, 0.0  ;;  %v1331_v56 = vpack.c.bf16 %v601_v52, %v600_v39  ;;  %1378 = vmatprep.subr.bf16.mxu0 %v1471_v48  ;;  %v738_v52 = vmul.u32 16, %v1857_v22 }
 0x190   :  { %v1100_v11 = vsel %vm633_vm0, 1.0, %v1468_v29  ;;  %vm681_vm2 = vcmp.ne.f32.partialorder %v1972_v55, 0.0  ;;  %v1355_v5 = vpack.c.bf16 %v1972_v55, %v1963_v42  ;;  %v557_v24 = vpop.f32.mrb[20].mxu0 }
 0x191   :  { %v1116_v25 = vsel %vm681_vm2, 1.0, %v1468_v29  ;;  %v602_v26 = vmul.f32 %v1069_v17, %v557_v24  ;;  %v559_v13 = vpop.f32.mrb[21].mxu0  ;;  %1332 = vmatpush3.bf16.msra.mxu1 %v1331_v56  ;;  %vm739_vm3 = vcmp.ge.s32.totalorder %v1779_v8, %v738_v52 }
 0x192   :  { %v729_v38 = vadd.f32 %v1116_v25, %v1100_v11  ;;  %v1983_v57 = vmul.f32 %v1069_v17, %v559_v13  ;;  %1333 = vmatprep.subr.bf16.mxu1 %v1471_v48  ;;  %v740_v13 = vadd.s32 16, %v738_v52 }
 0x193   :  { %vm634_vm4 = vcmp.ne.f32.partialorder %v602_v26, 0.0 }
 0x194   :  { %v1379_v58 = vpack.c.bf16 %v729_v38, %v728_v54  ;;  %v1101_v59 = vsel %vm634_vm4, 1.0, %v1468_v29  ;;  %vm682_vm5 = vcmp.ne.f32.partialorder %v1983_v57, 0.0  ;;  %v563_v62 = vpop.f32.mrb[22].mxu0  ;;  %vm741_vm4 = vcmp.lt.s32.totalorder %v1779_v8, %v740_v13 }
 0x195   :  { %v1117_v18 = vsel %vm682_vm5, 1.0, %v1468_v29  ;;  %v603_v14 = vmul.f32 %v1070_v60, %v563_v62  ;;  %v565_v1 = vpop.f32.mrb[23].mxu0 }
 0x196   :  { %v730_v3 = vadd.f32 %v1117_v18, %v1101_v59  ;;  %v1992_v6 = vmul.f32 %v1070_v60, %v565_v1  ;;  %1380 = vmatpush3.bf16.msra.mxu0 %v1379_v58  ;;  %v1074_v59 = vsel %vm366_vm15, 1.0, %v1468_v29 }
 0x197   :  { %vm635_vm7 = vcmp.ne.f32.partialorder %v603_v14, 0.0  ;;  %v1334_v7 = vpack.c.bf16 %v603_v14, %v602_v26  ;;  %1381 = vmatprep.subr.bf16.mxu0 %v1471_v48 }
 0x198   :  { %v1102_v28 = vsel %vm635_vm7, 1.0, %v1468_v29  ;;  %vm683_vm8 = vcmp.ne.f32.partialorder %v1992_v6, 0.0  ;;  %v1358_v30 = vpack.c.bf16 %v1992_v6, %v1983_v57  ;;  %v569_v9 = vpop.f32.mrb[24].mxu0  ;;  %vm2029_vm7 = vmand %vm739_vm3, %vm741_vm4 }
 0x199   :  { %v1118_v33 = vsel %vm683_vm8, 1.0, %v1468_v29  ;;  %v604_v34 = vmul.f32 %v1071_v19, %v569_v9  ;;  %v571_v15 = vpop.f32.mrb[25].mxu0  ;;  %1335 = vmatpush3.bf16.msra.mxu1 %v1334_v7  ;;  %vm1025_vm8 = vcmp.eq.s32.totalorder %v1779_v8, 0 }
 0x19a   :  { %v731_v36 = vadd.f32 %v1118_v33, %v1102_v28  ;;  %v2003_v37 = vmul.f32 %v1071_v19, %v571_v15  ;;  %1336 = vmatprep.subr.bf16.mxu1 %v1471_v48 }
 0x19b   :  { %vm636_vm10 = vcmp.ne.f32.partialorder %v604_v34, 0.0 }
 0x19c   :  { %v1382_v39 = vpack.c.bf16 %v731_v36, %v730_v3  ;;  %v1103_v41 = vsel %vm636_vm10, 1.0, %v1468_v29  ;;  %vm684_vm11 = vcmp.ne.f32.partialorder %v2003_v37, 0.0  ;;  %v575_v46 = vpop.f32.mrb[26].mxu0 }
 0x19d   :  { %v1119_v20 = vsel %vm684_vm11, 1.0, %v1468_v29  ;;  %v605_v47 = vmul.f32 %v1072_v10, %v575_v46  ;;  %v577_v49 = vpop.f32.mrb[27].mxu0 }
 0x19e   :  { %v732_v50 = vadd.f32 %v1119_v20, %v1103_v41  ;;  %v621_v16 = vmul.f32 %v1072_v10, %v577_v49  ;;  %1383 = vmatpush3.bf16.msra.mxu0 %v1382_v39 }
 0x19f   :  { %vm637_vm13 = vcmp.ne.f32.partialorder %v605_v47, 0.0  ;;  %v1337_v12 = vpack.c.bf16 %v605_v47, %v604_v34  ;;  %1384 = vmatprep.subr.bf16.mxu0 %v1471_v48 }
 0x1a0   :  { %v1104_v54 = vsel %vm637_vm13, 1.0, %v1468_v29  ;;  %vm685_vm14 = vcmp.ne.f32.partialorder %v621_v16, 0.0  ;;  %v1361_v56 = vpack.c.bf16 %v621_v16, %v2003_v37  ;;  %v581_v11 = vpop.f32.mrb[28].mxu0 }
 0x1a1   :  { %v1120_v17 = vsel %vm685_vm14, 1.0, %v1468_v29  ;;  %v606_v24 = vmul.f32 %v1073_v23, %v581_v11  ;;  %v583_v25 = vpop.f32.mrb[29].mxu0  ;;  %1338 = vmatpush3.bf16.msra.mxu1 %v1337_v12 }
 0x1a2   :  { %v733_v22 = vadd.f32 %v1120_v17, %v1104_v54  ;;  %v622_v26 = vmul.f32 %v1073_v23, %v583_v25  ;;  %1339 = vmatprep.subr.bf16.mxu1 %v1471_v48 }
 0x1a3   :  { %vm638_vm0 = vcmp.ne.f32.partialorder %v606_v24, 0.0 }
 0x1a4   :  { %v1385_v38 = vpack.c.bf16 %v733_v22, %v732_v50  ;;  %v1105_v58 = vsel %vm638_vm0, 1.0, %v1468_v29  ;;  %vm686_vm2 = vcmp.ne.f32.partialorder %v622_v26, 0.0  ;;  %v587_v60 = vpop.f32.mrb[30].mxu0 }
 0x1a5   :  { %v1121_v27 = vsel %vm686_vm2, 1.0, %v1468_v29  ;;  %v607_v62 = vmul.f32 %v1074_v59, %v587_v60  ;;  %v589_v18 = vpop.f32.mrb[31].mxu0 }
 0x1a6   :  { %v734_v14 = vadd.f32 %v1121_v27, %v1105_v58  ;;  %v623_v1 = vmul.f32 %v1074_v59, %v589_v18  ;;  %1386 = vmatpush3.bf16.msra.mxu0 %v1385_v38 }
 0x1a7   :  { %vm639_vm5 = vcmp.ne.f32.partialorder %v607_v62, 0.0  ;;  %v1340_v3 = vpack.c.bf16 %v607_v62, %v606_v24  ;;  %1387 = vmatprep.subr.bf16.mxu0 %v1471_v48 }
 0x1a8   :  { %v1106_v7 = vsel %vm639_vm5, 1.0, %v1468_v29  ;;  %vm687_vm6 = vcmp.ne.f32.partialorder %v623_v1, 0.0  ;;  %v1364_v28 = vpack.c.bf16 %v623_v1, %v622_v26 }
 0x1a9   :  { %v1122_v19 = vsel %vm687_vm6, 1.0, %v1468_v29  ;;  %1341 = vmatpush3.bf16.msra.mxu1 %v1340_v3 }
 0x1aa   :  { %v735_v33 = vadd.f32 %v1122_v19, %v1106_v7  ;;  %1342 = vmatprep.subr.bf16.mxu1 %v1471_v48 }
 0x1ac   :  { %v1388_v34 = vpack.c.bf16 %v735_v33, %v734_v14  ;;  %1214 = vmatmul.mubr.msk.f32.vlgmr.msra.gmra.mrb[0].mxu1 %vm2029_vm7, %v1470_v45 }
 0x1ad   :  { %1344 = vmatpush3.bf16.msra.mxu1 %v1343_v2  ;;  %1248 = vmatprep.mubr.msk.f32.mxu1 %vm1472_vm1, %v1468_v29 }
 0x1ae   :  { %1389 = vmatpush3.bf16.msra.mxu0 %v1388_v34  ;;  %1345 = vmatprep.subr.bf16.mxu1 %v1471_v48 }
 0x1b1   :  { %1347 = vmatpush3.bf16.msra.mxu1 %v1346_v44  ;;  %1284 = vmatmul.mubr.msk.f32.vlgmr.msra.gmra.mrb[32].mxu0 %vm2029_vm7, %v1470_v45 }
 0x1b2   :  { %1348 = vmatprep.subr.bf16.mxu1 %v1471_v48 }
 0x1b5   :  { %1350 = vmatpush3.bf16.msra.mxu1 %v1349_v43 }
 0x1b6   :  { %1351 = vmatprep.subr.bf16.mxu1 %v1471_v48 }
 0x1b9   :  { %1353 = vmatpush3.bf16.msra.mxu1 %v1352_v35 }
 0x1ba   :  { %1354 = vmatprep.subr.bf16.mxu1 %v1471_v48 }
 0x1bd   :  { %1356 = vmatpush3.bf16.msra.mxu1 %v1355_v5 }
 0x1be   :  { %1357 = vmatprep.subr.bf16.mxu1 %v1471_v48 }
 0x1c1   :  { %1359 = vmatpush3.bf16.msra.mxu1 %v1358_v30 }
 0x1c2   :  { %1360 = vmatprep.subr.bf16.mxu1 %v1471_v48 }
 0x1c5   :  { %1362 = vmatpush3.bf16.msra.mxu1 %v1361_v56 }
 0x1c6   :  { %1363 = vmatprep.subr.bf16.mxu1 %v1471_v48  ;;  %v1006_v48 = vpop.xlane.xlu1 %1005 }
 0x1c7   :  { %v1007_v43 = vmul.f32 %v1006_v48, %v1002_v51 }
 0x1c9   :  { %1365 = vmatpush3.bf16.msra.mxu1 %v1364_v28  ;;  %v1013_v35 = vmul.f32 2.5e-07, %v1007_v43 }
 0x1ca   :  { %v1010_v57 = vpop.xlane.xlu1 %1009 }
 0x1cb   :  { %v1011_v6 = vmul.f32 %v1010_v57, %v1002_v51 }
 0x1cc   :  { %1249 = vmatmul.mubr.msk.f32.vlgmr.msra.gmra.mrb[2].mxu1 %vm2029_vm7, %v1470_v45 }
 0x1cd   :  { %v1021_v15 = vmul.f32 2.5e-07, %v1011_v6 }
 0x27f   :  { %v811_v21 = vpop.f32.mrb[0].mxu1 }
 0x280   :  { %955 = vadd.xlane.f32.xlu0 %v811_v21  ;;  %v1215_v61 = vpop.f32.mrb[1].mxu1 }
 0x284   :  { %v951_v2 = vpop.f32.mrb[32].mxu0 }
 0x285   :  { %959 = vadd.xlane.f32.xlu0 %v951_v2  ;;  %v1285_v31 = vpop.f32.mrb[33].mxu0 }
 0x29f   :  { %v881_v40 = vpop.f32.mrb[2].mxu1 }
 0x2a0   :  { %957 = vadd.xlane.f32.xlu0 %v881_v40  ;;  %v1250_v44 = vpop.f32.mrb[3].mxu1 }
 0x30d   :  { %v956_v53 = vpop.xlane.xlu0 %955 }
 0x30e   :  { %v1128_v63 = vclamps-f32 %v956_v53, 400.0 }
 0x310   :  { %v1014_v42 = vsub.f32 %v1128_v63, %v1013_v35 }
 0x312   :  { %v960_v32 = vpop.xlane.xlu0 %959 }
 0x313   :  { %vm961_vm1 = vcmp.ge.f32.partialorder %v960_v32, 10.0 }
 0x314   :  { %v1127_v45 = vsel %vm961_vm1, 1.0, %v1468_v29 }
 0x315   :  { %v1012_v55 = vmul.f32 0.003, %v1127_v45 }
 0x317   :  { %v1015_v5 = vmul.f32 %v1014_v42, %v1012_v55 }
 0x319   :  { %1017 = vrot.lane.b32.xlu1 %v1015_v5, %s1473_s6 }
 0x32d   :  { %v958_v30 = vpop.xlane.xlu0 %957 }
 0x32e   :  { %v1129_v36 = vclamps-f32 %v958_v30, 400.0 }
 0x330   :  { %v1022_v37 = vsub.f32 %v1129_v36, %v1021_v15 }
 0x332   :  { %v1023_v39 = vmul.f32 %v1022_v37, %v1012_v55 }
 0x334   :  { %v1024_v41 = vsub.f32 %v1773_v4, %v1023_v39 }
 0x336   :  { %1028 = vperm.xlu0 %1463, %v1024_v41  }
 0x33a   :  { %1466 = vset.pattern.permute.xlu0 %v1467_v0 }
 0x38b   :  { %v1018_v10 = vpop.permute.xlu1 %1017 }
 0x38c   :  { %v1020_v29 = vsub.f32 %v1773_v4, %v1018_v10 }
 0x38e   :  { %1033 = vperm.xlu1 %1465, %v1020_v29  }
 0x3b5   :  { %v1029_v46 = vpop.permute.xlu0 %1028 }
 0x40d   :  { %v1034_v20 = vpop.permute.xlu1 %1033 }
 0x40e   :  { %v1036_v47 = vsel %vm1025_vm8, %v1029_v46, %v1034_v20 }
 0x40f   :  { %1038 = vst.msk [vmem:[%s2089_s8] sm:$0xff] %vm1037_vm9, %v1036_v47 }

</bundles_post_ra>
